<compile_context>
chip_gen: v5e
topology: v5e:2x2
jax: 0.10.0
libtpu: 0.0.40
codegen_flags: <defaults>
</compile_context>

<pallas_src>
import jax
import jax.numpy as jnp
from jax.experimental import pallas as pl
from jax.experimental.pallas import tpu as pltpu

D_IN = 100
D_OUT = 2


def lr_kernel(x_ref, w_ref, b_ref, o_ref):
    # [TB,100] @ [100,2] + [1,2] -> [TB,2] logits; MXU util is irrelevant
    # (mem-bound), the matmul is free under the input DMA.
    logits = jnp.dot(
        x_ref[...], w_ref[...], preferred_element_type=jnp.float32
    ) + b_ref[...]                                          # [TB, 2]

    # 2-class closed-form log-softmax — no cross-lane max/sum reduces,
    # single transcendental pair (exp + log1p), numerically stable.
    d = logits[:, 0:1] - logits[:, 1:2]                     # [TB, 1]
    sp = jnp.log1p(jnp.exp(-jnp.abs(d))) + jnp.maximum(-d, 0.0)  # softplus(-d)
    out0 = -sp                                              # log_softmax class 0
    out1 = out0 - d                                         # log_softmax class 1
    o_ref[...] = jnp.concatenate([out0, out1], axis=-1).astype(o_ref.dtype)


def lr_forward(x, weight, bias, *, tb=2048):
    """x: [B, 100] f32, weight: [2, 100] f32 (PyTorch layout), bias: [2] f32."""
    B = x.shape[0]
    w_t = weight.T                      # [100, 2] — glue reshape in plain JAX
    b2d = bias.reshape(1, D_OUT)        # [1, 2]

    # Batch tile: TB=2048 rows -> ~1 MiB/x buffer (128-lane padded f32), 2 MiB
    # double-buffered — comfortably under v7x's 32 MiB default scoped VMEM.
    # Small batches use a single full-extent block (still a valid block shape).
    TB = B if B <= tb else tb
    grid = (pl.cdiv(B, TB),)

    cost = pl.CostEstimate(
        flops=2 * B * D_IN * D_OUT + 8 * B,
        transcendentals=2 * B,
        bytes_accessed=B * D_IN * 4 + B * D_OUT * 4 + D_IN * D_OUT * 4 + D_OUT * 4,
    )

    return pl.pallas_call(
        lr_kernel,
        out_shape=jax.ShapeDtypeStruct((B, D_OUT), jnp.float32),
        grid_spec=pltpu.PrefetchScalarGridSpec(
            num_scalar_prefetch=0,
            grid=grid,
            in_specs=[
                pl.BlockSpec((TB, D_IN), lambda i: (i, 0)),     # streamed x tiles
                pl.BlockSpec((D_IN, D_OUT), lambda i: (0, 0)),  # resident weight
                pl.BlockSpec((1, D_OUT), lambda i: (0, 0)),     # resident bias
            ],
            out_specs=pl.BlockSpec((TB, D_OUT), lambda i: (i, 0)),
        ),
        compiler_params=pltpu.CompilerParams(
            # Batch axis has no reduction -> parallel; shards across the
            # 2 TensorCores on v7x, neutral on v5e/v6e.
            dimension_semantics=("parallel",),
        ),
        cost_estimate=cost,
    )(x, w_t, b2d)


def reference(x, weight, bias):
    logits = x @ weight.T + bias
    return jax.nn.log_softmax(logits, axis=-1)


if __name__ == "__main__":
    key = jax.random.PRNGKey(0)
    kx, kw, kb = jax.random.split(key, 3)

    B = 8
    # Deterministic parameter init (shapes from nn.Linear(100, 2)).
    bound = 1.0 / (D_IN ** 0.5)
    weight = jax.random.uniform(kw, (D_OUT, D_IN), jnp.float32, -bound, bound)
    bias = jax.random.uniform(kb, (D_OUT,), jnp.float32, -bound, bound)
    x = jax.random.normal(kx, (B, D_IN), jnp.float32)

    out = jax.block_until_ready(lr_forward(x, weight, bias))
    ref = reference(x, weight, bias)
    assert out.shape == (B, D_OUT), out.shape
    assert jnp.allclose(out, ref, atol=1e-5, rtol=1e-5), (
        float(jnp.max(jnp.abs(out - ref)))
    )

    # Exercise the multi-tile (pipelined) path as well, including a partial
    # last tile (B not a multiple of TB).
    B2 = 5000
    x2 = jax.random.normal(kx, (B2, D_IN), jnp.float32)
    out2 = jax.block_until_ready(lr_forward(x2, weight, bias))
    ref2 = reference(x2, weight, bias)
    assert out2.shape == (B2, D_OUT), out2.shape
    assert jnp.allclose(out2, ref2, atol=1e-5, rtol=1e-5), (
        float(jnp.max(jnp.abs(out2 - ref2)))
    )

    print("KERNEL_OK")
</pallas_src>

<mosaic_0001>
module attributes {stable_mosaic.version = 11 : i64} {
  func.func @lr_kernel(%arg0: i32, %arg1: memref<8x100xf32, #tpu.memory_space<vmem>>, %arg2: memref<100x2xf32, #tpu.memory_space<vmem>>, %arg3: memref<1x2xf32, #tpu.memory_space<vmem>>, %arg4: memref<8x2xf32, #tpu.memory_space<vmem>>) attributes {dimension_semantics = [#tpu.dimension_semantics<parallel>], iteration_bounds = array<i64: 1>, scalar_prefetch = 0 : i64, scratch_operands = 0 : i64, tpu.core_type = #tpu.core_type<tc>, window_params = [{transform_indices = @transform_0, window_bounds = array<i64: 8, 100>}, {pipeline_mode = #tpu.pipeline_mode<synchronous>, transform_indices = @transform_1, window_bounds = array<i64: 100, 2>}, {pipeline_mode = #tpu.pipeline_mode<synchronous>, transform_indices = @transform_2, window_bounds = array<i64: 1, 2>}, {transform_indices = @transform_3, window_bounds = array<i64: 8, 2>}]} {
    %c0 = arith.constant 0 : index
    %c0_0 = arith.constant 0 : index
    %0 = vector.load %arg1[%c0, %c0_0] : memref<8x100xf32, #tpu.memory_space<vmem>>, vector<8x100xf32>
    %c0_1 = arith.constant 0 : index
    %c0_2 = arith.constant 0 : index
    %1 = vector.load %arg2[%c0_1, %c0_2] : memref<100x2xf32, #tpu.memory_space<vmem>>, vector<100x2xf32>
    %cst = arith.constant dense<0.000000e+00> : vector<8x2xf32>
    %2 = tpu.matmul %0, %1, %cst {dimension_numbers = #tpu.dot_dimension_numbers<[1], [0], [0], [1], [0, 0, 1, 1], [], []>} : vector<8x100xf32>, vector<100x2xf32>, vector<8x2xf32> -> vector<8x2xf32>
    %c0_3 = arith.constant 0 : index
    %c0_4 = arith.constant 0 : index
    %3 = vector.load %arg3[%c0_3, %c0_4] : memref<1x2xf32, #tpu.memory_space<vmem>>, vector<1x2xf32>
    %4 = vector.broadcast %3 : vector<1x2xf32> to vector<8x2xf32>
    %5 = arith.addf %2, %4 : vector<8x2xf32>
    %6 = vector.extract_strided_slice %5 {offsets = [0, 0], sizes = [8, 1], strides = [1, 1]} : vector<8x2xf32> to vector<8x1xf32>
    %7 = vector.extract_strided_slice %5 {offsets = [0, 1], sizes = [8, 1], strides = [1, 1]} : vector<8x2xf32> to vector<8x1xf32>
    %8 = arith.subf %6, %7 : vector<8x1xf32>
    %9 = math.absf %8 : vector<8x1xf32>
    %cst_5 = arith.constant 0.000000e+00 : f32
    %10 = vector.broadcast %cst_5 : f32 to vector<8x1xf32>
    %11 = arith.subf %10, %9 : vector<8x1xf32>
    %12 = math.exp %11 : vector<8x1xf32>
    %13 = math.log1p %12 : vector<8x1xf32>
    %cst_6 = arith.constant 0.000000e+00 : f32
    %14 = vector.broadcast %cst_6 : f32 to vector<8x1xf32>
    %15 = arith.subf %14, %8 : vector<8x1xf32>
    %cst_7 = arith.constant 0.000000e+00 : f32
    %16 = vector.broadcast %cst_7 : f32 to vector<8x1xf32>
    %17 = arith.maximumf %15, %16 : vector<8x1xf32>
    %18 = arith.addf %13, %17 : vector<8x1xf32>
    %cst_8 = arith.constant 0.000000e+00 : f32
    %19 = vector.broadcast %cst_8 : f32 to vector<8x1xf32>
    %20 = arith.subf %19, %18 : vector<8x1xf32>
    %21 = arith.subf %20, %8 : vector<8x1xf32>
    %22 = tpu.concatenate %20, %21 in 1 : vector<8x1xf32>, vector<8x1xf32> -> vector<8x2xf32>
    %c0_9 = arith.constant 0 : index
    %c0_10 = arith.constant 0 : index
    %23 = vector.load %arg4[%c0_9, %c0_10] : memref<8x2xf32, #tpu.memory_space<vmem>>, vector<8x2xf32>
    tpu.vector_store %arg4[%c0_9, %c0_10], %22 {strides = array<i32>} : memref<8x2xf32, #tpu.memory_space<vmem>>, vector<8x2xf32>,
    return
  }
  func.func @transform_0(%arg0: i32) -> (i32, i32) {
    %c0_i32 = arith.constant 0 : i32
    %c0_i32_0 = arith.constant 0 : i32
    return %arg0, %c0_i32 : i32, i32
  }
  func.func @transform_1(%arg0: i32) -> (i32, i32) {
    %c0_i32 = arith.constant 0 : i32
    %c0_i32_0 = arith.constant 0 : i32
    %c0_i32_1 = arith.constant 0 : i32
    return %c0_i32, %c0_i32_0 : i32, i32
  }
  func.func @transform_2(%arg0: i32) -> (i32, i32) {
    %c0_i32 = arith.constant 0 : i32
    %c0_i32_0 = arith.constant 0 : i32
    %c0_i32_1 = arith.constant 0 : i32
    return %c0_i32, %c0_i32_0 : i32, i32
  }
  func.func @transform_3(%arg0: i32) -> (i32, i32) {
    %c0_i32 = arith.constant 0 : i32
    %c0_i32_0 = arith.constant 0 : i32
    return %arg0, %c0_i32 : i32, i32
  }
}

</mosaic_0001>

<bundles_post_ra>
// kernel: tpu_custom_call.1
= control target key start
LH: loop header
LB: loop body
LE: loop exit
PB: predicated region body
PF: predicated region fallthrough
CT: control target
= control target key end

     0   :  { %vm36_vm0 = vcmask 1043456   ;;  %vm32_vm1 = vcmask 818176   ;;  %s104_s15 = smov 127   ;;  %vm87_vm3 = vcmask 7168   ;;  %vm89_vm4 = vcmask 15360   ;;  %s174_s1 = inlined_call_operand.vmem [shape: f32[100,2], index: 1, kind: input, shape index: {}]   ;;  %s175_s2 = inlined_call_operand.vmem [shape: f32[1,2], index: 2, kind: input, shape index: {}]   ;;  %s176_s0 = inlined_call_operand.vmem [shape: f32[8,100], index: 0, kind: input, shape index: {}]   ;;  %s177_s3 = inlined_call_operand.vmem [shape: f32[8,2], index: 3, kind: output, shape index: {}]  }
   0x1   :  { %v27_v0 = vld [vmem:[%s174_s1 + $0x60] sm:$0xf]  ;;  %v26_v1 = vld [vmem:[%s174_s1 + $0x58] sm:$0xff]  ;;  %v25_v2 = vld [vmem:[%s174_s1 + $0x50] sm:$0xff] }
   0x2   :  { %95 = vmatpush.msk.msra.mxu0 %vm36_vm0, %v27_v0  ;;  %v24_v3 = vld [vmem:[%s174_s1 + $0x48] sm:$0xff]  ;;  %v23_v4 = vld [vmem:[%s174_s1 + $0x40] sm:$0xff]  ;;  %v22_v5 = vld [vmem:[%s174_s1 + $0x38] sm:$0xff] }
   0x3   :  { %v21_v6 = vld [vmem:[%s174_s1 + $0x30] sm:$0xff]  ;;  %v20_v7 = vld [vmem:[%s174_s1 + $0x28] sm:$0xff]  ;;  %v19_v8 = vld [vmem:[%s174_s1 + $0x20] sm:$0xff] }
   0x4   :  { %44 = vmatpush.msra.mxu0 %v26_v1  ;;  %v18_v9 = vld [vmem:[%s174_s1 + $0x18] sm:$0xff]  ;;  %v17_v10 = vld [vmem:[%s174_s1 + $0x10] sm:$0xff]  ;;  %v16_v11 = vld [vmem:[%s174_s1 + $0x8] sm:$0xff] }
   0x5   :  { %v15_v12 = vld [vmem:[%s174_s1] sm:$0xff] }
   0x6   :  { %45 = vmatpush.msra.mxu0 %v25_v2  ;;  %v14_v13 = vld [vmem:[%s176_s0] sm:$0xff]  ;;  %s105_s0 = smov 1  }
   0x7   :  { %v99_v14 = vld [vmem:[%s175_s2] ss:$0 sm:$0xff] }
   0x8   :  { %46 = vmatpush.msra.mxu0 %v24_v3 }
   0xa   :  { %47 = vmatpush.msra.mxu0 %v23_v4 }
   0xc   :  { %48 = vmatpush.msra.mxu0 %v22_v5 }
   0xe   :  { %49 = vmatpush.msra.mxu0 %v21_v6 }
  0x10   :  { %50 = vmatpush.msra.mxu0 %v20_v7 }
  0x12   :  { %51 = vmatpush.msra.mxu0 %v19_v8 }
  0x14   :  { %52 = vmatpush.msra.mxu0 %v18_v9 }
  0x16   :  { %53 = vmatpush.msra.mxu0 %v17_v10 }
  0x18   :  { %54 = vmatpush.msra.mxu0 %v16_v11 }
  0x1a   :  { %55 = vmatpush.msra.mxu0 %v15_v12 }
  0x1b   :  { %96 = vmatmul.msk.f32.vlgmr.msra.gmra.mxu0 %vm32_vm1, %v14_v13 }
  0x98   :  { %v57_v15 = vpop.f32.mrf.mxu0 }
  0x99   :  { %v58_v16 = vadd.f32 %v99_v14, %v57_v15 }
  0x9b   :  { %61 = vrot.lane.b32.xlu0 %v58_v16, %s104_s15 }
 0x10d   :  { %v62_v17 = vpop.permute.xlu0 %61 }
 0x10e   :  { %v64_v18 = vsub.f32 %v58_v16, %v62_v17 }
 0x110   :  { %v65_v19 = vand.u32 2147483647, %v64_v18  ;;  %v78_v26 = vsub.f32 0.0, %v64_v18 }
 0x112   :  { %v66_v20 = vsub.f32 0.0, %v65_v19  ;;  %v79_v31 = vmax.f32 %v78_v26, 0.0 }
 0x114   :  { %v67_v21 = vmul.f32 1.442695, %v66_v20 }
 0x116   :  { %100 = vpow2.f32 %v67_v21 }
 0x11c   :  { %v101_v22 = vpop.eup %100 }
 0x11d   :  { %v69_v23 = vadd.f32 1.0, %v101_v22  ;;  %v72_v24 = vmul.f32 -0.5, %v101_v22  ;;  %v75_v27 = vand.u32 2147483647, %v101_v22 }
 0x11f   :  { %102 = vlog2.f32 %v69_v23  ;;  %v73_v25 = vadd.f32 1.0, %v72_v24  ;;  %vm76_vm2 = vcmp.lt.f32.partialorder %v75_v27, 0.0004427343 }
 0x121   :  { %v74_v30 = vmul.f32 %v101_v22, %v73_v25 }
 0x125   :  { %v103_v28 = vpop.eup %102 }
 0x126   :  { %v71_v29 = vmul.f32 0.6931472, %v103_v28 }
 0x128   :  { %v77_v32 = vsel %vm76_vm2, %v74_v30, %v71_v29 }
 0x129   :  { %v80_v33 = vadd.f32 %v79_v31, %v77_v32 }
 0x12b   :  { %v81_v34 = vsub.f32 0.0, %v80_v33 }
 0x12d   :  { %v82_v35 = vsub.f32 %v81_v34, %v64_v18 }
 0x12f   :  { %84 = vrot.lane.b32.xlu0 %v82_v35, %s105_s0 }
 0x1a1   :  { %v85_v36 = vpop.permute.xlu0 %84 }
 0x1a2   :  { %v88_v37 = vsel %vm87_vm3, %v81_v34, %v85_v36 }
 0x1a3   :  { %90 = vst.msk [vmem:[%s177_s3] sm:$0xff] %vm89_vm4, %v88_v37 }

</bundles_post_ra>
